<compile_context>
chip_gen: v7x
topology: tpu7x:2x2x1
jax: 0.10.0
libtpu: 0.0.40
codegen_flags: <defaults>
</compile_context>

<pallas_src>
import functools

import numpy as np
import jax
import jax.numpy as jnp
from jax import lax
from jax.experimental import pallas as pl
from jax.experimental.pallas import tpu as pltpu

# bf16 runs the MXU at full rate on v5e/v6e/v7x and halves HBM/VMEM traffic.
# Accumulation stays f32 via preferred_element_type.
MXU_DTYPE = jnp.bfloat16


# ---------------------------------------------------------------------------
# Tiled linear kernel:  y = x @ w   (w already transposed to (K, N) + bf16)
# ---------------------------------------------------------------------------
def _linear_kernel(x_ref, w_ref, o_ref, acc_ref):
    @pl.when(pl.program_id(2) == 0)
    def _():
        acc_ref[...] = jnp.zeros_like(acc_ref)

    acc_ref[...] += jnp.dot(x_ref[...], w_ref[...],
                            preferred_element_type=jnp.float32)

    @pl.when(pl.program_id(2) == pl.num_programs(2) - 1)
    def _():
        o_ref[...] = acc_ref[...].astype(o_ref.dtype)


def _round_up(x, m):
    return ((x + m - 1) // m) * m


def _tile_and_pad(dim, target, align):
    """Return (tile, padded_dim).

    Prefer the largest aligned divisor of `dim` that is <= target (no padding);
    otherwise use `target`-sized tiles and pad `dim` up to a tile multiple
    (no silent full-dim fallback that could blow VMEM at production sizes).
    """
    if dim <= target:
        return dim, dim                 # single full-extent block (always legal)
    if dim % align == 0:
        t = (target // align) * align
        while t >= align:
            if dim % t == 0:
                return t, dim
            t -= align
    t = (target // align) * align
    return t, _round_up(dim, t)


def pallas_linear(x, w, out_dtype=None):
    """y = x @ w ;  x: (M, K), w: (K, N).  Weights pre-cast/pre-transposed by caller."""
    M, K = x.shape
    K2, N = w.shape
    assert K == K2
    out_dtype = out_dtype or x.dtype

    # 512-class tiles: measured tiled-matmul HBM-roofline fraction improves
    # ~63% -> ~85% moving from 256 to 512 tiles, and fewer grid steps amortize
    # the ~0.35us/step overhead.
    tm, Mp = _tile_and_pad(M, 512, 16)
    tn, Np = _tile_and_pad(N, 512, 256)
    tk, Kp = _tile_and_pad(K, 1024, 128)

    if (Mp, Kp) != (M, K):
        x = jnp.pad(x, ((0, Mp - M), (0, Kp - K)))
    if (Kp, Np) != (K, N):
        w = jnp.pad(w, ((0, Kp - K), (0, Np - N)))

    grid = (Mp // tm, Np // tn, Kp // tk)

    in_b = np.dtype(x.dtype).itemsize
    out_b = np.dtype(out_dtype).itemsize
    vmem_bytes = (2 * (tm * tk + tk * tn) * in_b     # double-buffered inputs
                  + 2 * tm * tn * out_b              # double-buffered output
                  + tm * tn * 4)                     # f32 accumulator
    vmem_limit = int(min(100 * 1024 * 1024, max(2 * vmem_bytes, 24 * 1024 * 1024)))

    y = pl.pallas_call(
        _linear_kernel,
        out_shape=jax.ShapeDtypeStruct((Mp, Np), out_dtype),
        grid_spec=pltpu.PrefetchScalarGridSpec(
            num_scalar_prefetch=0,
            grid=grid,
            in_specs=[
                pl.BlockSpec((tm, tk), lambda i, j, k: (i, k)),
                pl.BlockSpec((tk, tn), lambda i, j, k: (k, j)),
            ],
            out_specs=pl.BlockSpec((tm, tn), lambda i, j, k: (i, j)),
            scratch_shapes=[pltpu.VMEM((tm, tn), jnp.float32)],
        ),
        compiler_params=pltpu.CompilerParams(
            dimension_semantics=("parallel", "parallel", "arbitrary"),
            vmem_limit_bytes=vmem_limit,
        ),
        cost_estimate=pl.CostEstimate(
            flops=2 * M * N * K,
            transcendentals=0,
            bytes_accessed=in_b * (M * K + K * N) + out_b * M * N,
        ),
    )(x, w)

    if (Mp, Np) != (M, N):
        y = y[:M, :N]
    return y


# ---------------------------------------------------------------------------
# Fused RoPE + causal attention kernel.  One grid step per (batch, head);
# q/k/v are head-major (B, H, S, dh) so every block is a lane-dense DMA.
# ---------------------------------------------------------------------------
def _attn_kernel(q_ref, k_ref, v_ref, cos_ref, sin_ref, bias_ref, o_ref, *, scale):
    dh = q_ref.shape[-1]
    half = dh // 2

    cos = cos_ref[...]              # (S, dh) f32
    sin = sin_ref[...]              # (S, dh) f32, sign-folded: concat(-sin_h, sin_h)

    def rope(x):                    # x: (S, dh) f32
        # rotate_half(x)*sin == roll(x, dh/2)*sin_signed  -> XLU roll, no concat/negate
        return x * cos + pltpu.roll(x, shift=half, axis=1) * sin

    q = rope(q_ref[...].astype(jnp.float32)).astype(MXU_DTYPE)
    k = rope(k_ref[...].astype(jnp.float32)).astype(MXU_DTYPE)

    # scores = q @ k^T (contract head dim), f32 accumulation on the MXU.
    s = lax.dot_general(q, k, dimension_numbers=(((1,), (1,)), ((), ())),
                        preferred_element_type=jnp.float32)
    s = s * scale + bias_ref[...]   # hoisted causal bias (0 / -1e30), shared across steps

    m = jnp.max(s, axis=-1, keepdims=True)
    p = jnp.exp(s - m)
    l = jnp.sum(p, axis=-1, keepdims=True)

    out = jnp.dot(p.astype(MXU_DTYPE), v_ref[...],
                  preferred_element_type=jnp.float32)
    # Deferred normalization; approx reciprocal lands on the (idle) EUP slot.
    o_ref[...] = (out * pl.reciprocal(l, approx=True)).astype(o_ref.dtype)


def pallas_attention(q, k, v, cos, sin_signed, bias, scale):
    """q, k, v: (B, H, S, dh) head-major.  Returns (B, H, S, dh)."""
    B, H, S, dh = q.shape
    kernel = functools.partial(_attn_kernel, scale=scale)
    head_spec = pl.BlockSpec((None, None, S, dh), lambda b, h: (b, h, 0, 0))
    tab_spec = pl.BlockSpec((S, dh), lambda b, h: (0, 0))
    q_bytes = np.dtype(q.dtype).itemsize
    return pl.pallas_call(
        kernel,
        out_shape=jax.ShapeDtypeStruct((B, H, S, dh), q.dtype),
        grid_spec=pltpu.PrefetchScalarGridSpec(
            num_scalar_prefetch=0,
            grid=(B, H),
            in_specs=[
                head_spec,                                   # q
                head_spec,                                   # k
                head_spec,                                   # v
                tab_spec,                                    # cos
                tab_spec,                                    # sin (sign-folded)
                pl.BlockSpec((S, S), lambda b, h: (0, 0)),   # causal bias
            ],
            out_specs=pl.BlockSpec((None, None, S, dh), lambda b, h: (b, h, 0, 0)),
        ),
        compiler_params=pltpu.CompilerParams(
            dimension_semantics=("parallel", "parallel"),
        ),
        cost_estimate=pl.CostEstimate(
            flops=4 * B * H * S * S * dh,
            transcendentals=B * H * (S * S + S),
            bytes_accessed=q_bytes * 4 * B * H * S * dh + 4 * (2 * S * dh + S * S),
        ),
    )(q, k, v, cos, sin_signed, bias)


# ---------------------------------------------------------------------------
# Module-level wrapper
# ---------------------------------------------------------------------------
def rope_tables(seq_len, dim_head, base=10000.0):
    idx = jnp.arange(seq_len, dtype=jnp.float32)
    scale = 1.0 / base ** (jnp.arange(0, dim_head, 2, dtype=jnp.float32) / dim_head)
    pos = jnp.outer(idx, scale)                         # (S, dh/2)
    pos = jnp.concatenate([pos, pos], axis=-1)          # (S, dh)
    return jnp.cos(pos), jnp.sin(pos)


def causal_bias(seq_len):
    mask = jnp.triu(jnp.ones((seq_len, seq_len), dtype=bool), k=1)
    return jnp.where(mask, jnp.float32(-1e30), jnp.float32(0.0))


def multi_head_attention(x, w_qkv, w_out, cos, sin, num_heads, dim_k):
    B, S, D = x.shape
    dh = D // num_heads
    half = dh // 2

    # One-time weight prep in the wrapper: cast to bf16 BEFORE the kernel DMA and
    # transpose to (K, N) so the kernel matmul is MXU-canonical (no per-tile
    # RHS transpose inside the k-loop).
    w_qkv_t = w_qkv.astype(MXU_DTYPE).T                 # (D, 3D)
    w_out_t = w_out.astype(MXU_DTYPE).T                 # (D, D)

    # Sign-folded sin so RoPE is exactly  x*cos + roll(x, dh/2)*sin_signed.
    sign = jnp.concatenate([-jnp.ones((half,), jnp.float32),
                            jnp.ones((half,), jnp.float32)])
    sin_signed = sin * sign[None, :]
    bias = causal_bias(S)

    # QKV projection (bf16 in / bf16 out over HBM, f32 accumulation).
    qkv = pallas_linear(x.astype(MXU_DTYPE).reshape(B * S, D), w_qkv_t,
                        out_dtype=MXU_DTYPE)            # (B*S, 3D)

    # One wrapper transpose to head-major so each head's (S, dh) q/k/v block is a
    # lane-dense BlockSpec DMA (no dh-wide lane slicing inside the kernel).
    qkv = qkv.reshape(B, S, 3, num_heads, dh).transpose(2, 0, 3, 1, 4)  # (3,B,H,S,dh)
    q, k, v = qkv[0], qkv[1], qkv[2]

    attn = pallas_attention(q, k, v, cos, sin_signed, bias,
                            float(dim_k) ** -0.5)       # (B, H, S, dh) bf16
    attn = attn.transpose(0, 2, 1, 3).reshape(B * S, D)

    # Output projection; module output in f32.
    out = pallas_linear(attn, w_out_t, out_dtype=jnp.float32)
    return out.reshape(B, S, D)


# ---------------------------------------------------------------------------
# Pure-JAX reference for verification
# ---------------------------------------------------------------------------
def reference_mha(x, w_qkv, w_out, cos, sin, num_heads, dim_k):
    B, S, D = x.shape
    dh = D // num_heads
    qkv = x @ w_qkv.T
    q, k, v = jnp.split(qkv, 3, axis=-1)

    def to_heads(t):
        return t.reshape(B, S, num_heads, dh).transpose(0, 2, 1, 3)

    q, k, v = to_heads(q), to_heads(k), to_heads(v)

    def rope(t):
        t1, t2 = t[..., : dh // 2], t[..., dh // 2:]
        rot = jnp.concatenate([-t2, t1], axis=-1)
        return t * cos[None, None] + rot * sin[None, None]

    q, k = rope(q), rope(k)
    scores = jnp.einsum("bhqd,bhkd->bhqk", q, k) * (float(dim_k) ** -0.5)
    mask = jnp.triu(jnp.ones((S, S), dtype=bool), k=1)
    scores = jnp.where(mask[None, None], -jnp.inf, scores)
    p = jax.nn.softmax(scores, axis=-1)
    out = jnp.einsum("bhqk,bhkd->bhqd", p, v)
    out = out.transpose(0, 2, 1, 3).reshape(B, S, D)
    return out @ w_out.T


if __name__ == "__main__":
    # Small shapes consistent with the module: batch=2, seq_len=8, heads=2.
    # dim_emb=256 -> dim_head=128 (one full vreg lane width), which keeps the
    # RoPE lane-roll and every q/k/v/output block lane-dense.
    B, S, D, H = 2, 8, 256, 2
    dim_k = D                      # module default: dim_k = dim_emb
    dh = D // H

    key = jax.random.PRNGKey(0)
    kx, kqkv, kout = jax.random.split(key, 3)
    x = jax.random.normal(kx, (B, S, D), dtype=jnp.float32)
    # PyTorch Linear weights are (out_features, in_features)
    w_qkv = jax.random.normal(kqkv, (3 * D, D), dtype=jnp.float32) * (D ** -0.5)
    w_out = jax.random.normal(kout, (D, D), dtype=jnp.float32) * (D ** -0.5)

    cos, sin = rope_tables(S, dh)

    fwd = jax.jit(lambda xx, wq, wo: multi_head_attention(xx, wq, wo, cos, sin, H, dim_k))
    out = jax.block_until_ready(fwd(x, w_qkv, w_out))
    assert out.shape == (B, S, D)

    # Reference computed in f32 on bf16-rounded inputs/weights (the kernel runs
    # the MXU in bf16); tolerance sized to bf16 intermediate storage error.
    rnd = lambda a: a.astype(jnp.bfloat16).astype(jnp.float32)
    ref = reference_mha(rnd(x), rnd(w_qkv), rnd(w_out), cos, sin, H, dim_k)
    err = float(jnp.max(jnp.abs(out - ref)))
    assert jnp.allclose(out, ref, atol=5e-2, rtol=5e-2), f"max abs err = {err}"
    print("KERNEL_OK")
</pallas_src>

<mosaic_0001>
module attributes {stable_mosaic.version = 11 : i64} {
  func.func @_linear_kernel(%arg0: i32, %arg1: i32, %arg2: i32, %arg3: memref<16x256xbf16, #tpu.memory_space<vmem>>, %arg4: memref<256x256xbf16, #tpu.memory_space<vmem>>, %arg5: memref<16x256xbf16, #tpu.memory_space<vmem>>, %arg6: memref<16x256xf32, #tpu.memory_space<vmem>>) attributes {dimension_semantics = [#tpu.dimension_semantics<parallel>, #tpu.dimension_semantics<parallel>, #tpu.dimension_semantics<arbitrary>], iteration_bounds = array<i64: 1, 3, 1>, scalar_prefetch = 0 : i64, scratch_operands = 1 : i64, tpu.core_type = #tpu.core_type<tc>, window_params = [{transform_indices = @transform_0, window_bounds = array<i64: 16, 256>}, {transform_indices = @transform_1, window_bounds = array<i64: 256, 256>}, {transform_indices = @transform_2, window_bounds = array<i64: 16, 256>}]} {
    %c0_i32 = arith.constant 0 : i32
    %0 = arith.cmpi eq, %arg2, %c0_i32 : i32
    %1 = arith.extui %0 : i1 to i32
    %c0_i32_0 = arith.constant 0 : i32
    %2 = arith.cmpi ne, %1, %c0_i32_0 : i32
    scf.if %2 {
      %cst_10 = arith.constant 0.000000e+00 : f32
      %12 = vector.broadcast %cst_10 : f32 to vector<16x256xf32>
      %c0_11 = arith.constant 0 : index
      %c0_12 = arith.constant 0 : index
      %13 = vector.load %arg6[%c0_11, %c0_12] : memref<16x256xf32, #tpu.memory_space<vmem>>, vector<16x256xf32>
      tpu.vector_store %arg6[%c0_11, %c0_12], %12 {strides = array<i32>} : memref<16x256xf32, #tpu.memory_space<vmem>>, vector<16x256xf32>,
    } else {
    }
    %c0 = arith.constant 0 : index
    %c0_1 = arith.constant 0 : index
    %3 = vector.load %arg6[%c0, %c0_1] : memref<16x256xf32, #tpu.memory_space<vmem>>, vector<16x256xf32>
    %c0_2 = arith.constant 0 : index
    %c0_3 = arith.constant 0 : index
    %4 = vector.load %arg3[%c0_2, %c0_3] : memref<16x256xbf16, #tpu.memory_space<vmem>>, vector<16x256xbf16>
    %c0_4 = arith.constant 0 : index
    %c0_5 = arith.constant 0 : index
    %5 = vector.load %arg4[%c0_4, %c0_5] : memref<256x256xbf16, #tpu.memory_space<vmem>>, vector<256x256xbf16>
    %cst = arith.constant dense<0.000000e+00> : vector<16x256xf32>
    %6 = tpu.matmul %4, %5, %cst {dimension_numbers = #tpu.dot_dimension_numbers<[1], [0], [0], [1], [0, 0, 1, 1], [], []>} : vector<16x256xbf16>, vector<256x256xbf16>, vector<16x256xf32> -> vector<16x256xf32>
    %7 = arith.addf %3, %6 : vector<16x256xf32>
    %c0_6 = arith.constant 0 : index
    %c0_7 = arith.constant 0 : index
    %8 = vector.load %arg6[%c0_6, %c0_7] : memref<16x256xf32, #tpu.memory_space<vmem>>, vector<16x256xf32>
    tpu.vector_store %arg6[%c0_6, %c0_7], %7 {strides = array<i32>} : memref<16x256xf32, #tpu.memory_space<vmem>>, vector<16x256xf32>,
    %c0_i32_8 = arith.constant 0 : i32
    %9 = arith.cmpi eq, %arg2, %c0_i32_8 : i32
    %10 = arith.extui %9 : i1 to i32
    %c0_i32_9 = arith.constant 0 : i32
    %11 = arith.cmpi ne, %10, %c0_i32_9 : i32
    scf.if %11 {
      %c0_10 = arith.constant 0 : index
      %c0_11 = arith.constant 0 : index
      %12 = vector.load %arg6[%c0_10, %c0_11] : memref<16x256xf32, #tpu.memory_space<vmem>>, vector<16x256xf32>
      %13 = arith.truncf %12 : vector<16x256xf32> to vector<16x256xbf16>
      %c0_12 = arith.constant 0 : index
      %c0_13 = arith.constant 0 : index
      %14 = vector.load %arg5[%c0_12, %c0_13] : memref<16x256xbf16, #tpu.memory_space<vmem>>, vector<16x256xbf16>
      tpu.vector_store %arg5[%c0_12, %c0_13], %13 {strides = array<i32>} : memref<16x256xbf16, #tpu.memory_space<vmem>>, vector<16x256xbf16>,
    } else {
    }
    return
  }
  func.func @transform_0(%arg0: i32, %arg1: i32, %arg2: i32) -> (i32, i32) {
    %c0_i32 = arith.constant 0 : i32
    return %arg0, %arg2 : i32, i32
  }
  func.func @transform_1(%arg0: i32, %arg1: i32, %arg2: i32) -> (i32, i32) {
    %c0_i32 = arith.constant 0 : i32
    return %arg2, %arg1 : i32, i32
  }
  func.func @transform_2(%arg0: i32, %arg1: i32, %arg2: i32) -> (i32, i32) {
    %c0_i32 = arith.constant 0 : i32
    return %arg0, %arg1 : i32, i32
  }
}

module attributes {stable_mosaic.version = 11 : i64} {
  func.func @_attn_kernel(%arg0: i32, %arg1: i32, %arg2: memref<1x1x8x128xbf16, #tpu.memory_space<vmem>>, %arg3: memref<1x1x8x128xbf16, #tpu.memory_space<vmem>>, %arg4: memref<1x1x8x128xbf16, #tpu.memory_space<vmem>>, %arg5: memref<8x128xf32, #tpu.memory_space<vmem>>, %arg6: memref<8x128xf32, #tpu.memory_space<vmem>>, %arg7: memref<8x8xf32, #tpu.memory_space<vmem>>, %arg8: memref<1x1x8x128xbf16, #tpu.memory_space<vmem>>) attributes {dimension_semantics = [#tpu.dimension_semantics<parallel>, #tpu.dimension_semantics<parallel>], iteration_bounds = array<i64: 2, 2>, scalar_prefetch = 0 : i64, scratch_operands = 0 : i64, tpu.core_type = #tpu.core_type<tc>, window_params = [{transform_indices = @transform_0, window_bounds = array<i64: 1, 1, 8, 128>}, {transform_indices = @transform_1, window_bounds = array<i64: 1, 1, 8, 128>}, {transform_indices = @transform_2, window_bounds = array<i64: 1, 1, 8, 128>}, {pipeline_mode = #tpu.pipeline_mode<synchronous>, transform_indices = @transform_3, window_bounds = array<i64: 8, 128>}, {pipeline_mode = #tpu.pipeline_mode<synchronous>, transform_indices = @transform_4, window_bounds = array<i64: 8, 128>}, {pipeline_mode = #tpu.pipeline_mode<synchronous>, transform_indices = @transform_5, window_bounds = array<i64: 8, 8>}, {transform_indices = @transform_6, window_bounds = array<i64: 1, 1, 8, 128>}]} {
    %c0 = arith.constant 0 : index
    %c0_0 = arith.constant 0 : index
    %0 = vector.load %arg5[%c0, %c0_0] : memref<8x128xf32, #tpu.memory_space<vmem>>, vector<8x128xf32>
    %c0_1 = arith.constant 0 : index
    %c0_2 = arith.constant 0 : index
    %1 = vector.load %arg6[%c0_1, %c0_2] : memref<8x128xf32, #tpu.memory_space<vmem>>, vector<8x128xf32>
    %c0_3 = arith.constant 0 : index
    %c0_4 = arith.constant 0 : index
    %c0_5 = arith.constant 0 : index
    %c0_6 = arith.constant 0 : index
    %2 = vector.load %arg2[%c0_3, %c0_4, %c0_5, %c0_6] : memref<1x1x8x128xbf16, #tpu.memory_space<vmem>>, vector<1x1x8x128xbf16>
    %3 = vector.shape_cast %2 : vector<1x1x8x128xbf16> to vector<8x128xbf16>
    %4 = arith.extf %3 : vector<8x128xbf16> to vector<8x128xf32>
    %5 = arith.mulf %4, %0 : vector<8x128xf32>
    %c64_i32 = arith.constant 64 : i32
    %6 = tpu.dynamic_rotate %4 by %c64_i32 dim 1 : vector<8x128xf32>, i32 -> vector<8x128xf32>
    %7 = arith.mulf %6, %1 : vector<8x128xf32>
    %8 = arith.addf %5, %7 : vector<8x128xf32>
    %9 = arith.truncf %8 : vector<8x128xf32> to vector<8x128xbf16>
    %c0_7 = arith.constant 0 : index
    %c0_8 = arith.constant 0 : index
    %c0_9 = arith.constant 0 : index
    %c0_10 = arith.constant 0 : index
    %10 = vector.load %arg3[%c0_7, %c0_8, %c0_9, %c0_10] : memref<1x1x8x128xbf16, #tpu.memory_space<vmem>>, vector<1x1x8x128xbf16>
    %11 = vector.shape_cast %10 : vector<1x1x8x128xbf16> to vector<8x128xbf16>
    %12 = arith.extf %11 : vector<8x128xbf16> to vector<8x128xf32>
    %13 = arith.mulf %12, %0 : vector<8x128xf32>
    %c64_i32_11 = arith.constant 64 : i32
    %14 = tpu.dynamic_rotate %12 by %c64_i32_11 dim 1 : vector<8x128xf32>, i32 -> vector<8x128xf32>
    %15 = arith.mulf %14, %1 : vector<8x128xf32>
    %16 = arith.addf %13, %15 : vector<8x128xf32>
    %17 = arith.truncf %16 : vector<8x128xf32> to vector<8x128xbf16>
    %cst = arith.constant dense<0.000000e+00> : vector<8x8xf32>
    %18 = tpu.matmul %9, %17, %cst {dimension_numbers = #tpu.dot_dimension_numbers<[1], [1], [0], [0], [0, 0, 1, 0], [], []>} : vector<8x128xbf16>, vector<8x128xbf16>, vector<8x8xf32> -> vector<8x8xf32>
    %cst_12 = arith.constant 6.250000e-02 : f32
    %19 = vector.broadcast %cst_12 : f32 to vector<8x8xf32>
    %20 = arith.mulf %18, %19 : vector<8x8xf32>
    %c0_13 = arith.constant 0 : index
    %c0_14 = arith.constant 0 : index
    %21 = vector.load %arg7[%c0_13, %c0_14] : memref<8x8xf32, #tpu.memory_space<vmem>>, vector<8x8xf32>
    %22 = arith.addf %20, %21 : vector<8x8xf32>
    %cst_15 = arith.constant dense<0xFF800000> : vector<8xf32>
    %23 = vector.multi_reduction <maximumf>, %22, %cst_15 [1] : vector<8x8xf32> to vector<8xf32>
    %24 = vector.shape_cast %23 : vector<8xf32> to vector<8x1xf32>
    %25 = vector.broadcast %24 : vector<8x1xf32> to vector<8x8xf32>
    %26 = arith.subf %22, %25 : vector<8x8xf32>
    %27 = math.exp %26 : vector<8x8xf32>
    %cst_16 = arith.constant dense<0.000000e+00> : vector<8xf32>
    %28 = vector.multi_reduction <add>, %27, %cst_16 [1] : vector<8x8xf32> to vector<8xf32>
    %29 = vector.shape_cast %28 : vector<8xf32> to vector<8x1xf32>
    %30 = arith.truncf %27 : vector<8x8xf32> to vector<8x8xbf16>
    %c0_17 = arith.constant 0 : index
    %c0_18 = arith.constant 0 : index
    %c0_19 = arith.constant 0 : index
    %c0_20 = arith.constant 0 : index
    %31 = vector.load %arg4[%c0_17, %c0_18, %c0_19, %c0_20] : memref<1x1x8x128xbf16, #tpu.memory_space<vmem>>, vector<1x1x8x128xbf16>
    %32 = vector.shape_cast %31 : vector<1x1x8x128xbf16> to vector<8x128xbf16>
    %cst_21 = arith.constant dense<0.000000e+00> : vector<8x128xf32>
    %33 = tpu.matmul %30, %32, %cst_21 {dimension_numbers = #tpu.dot_dimension_numbers<[1], [0], [0], [1], [0, 0, 1, 1], [], []>} : vector<8x8xbf16>, vector<8x128xbf16>, vector<8x128xf32> -> vector<8x128xf32>
    %34 = tpu.reciprocal %29 {approx = true} : vector<8x1xf32> -> vector<8x1xf32>
    %35 = vector.broadcast %34 : vector<8x1xf32> to vector<8x128xf32>
    %36 = arith.mulf %33, %35 : vector<8x128xf32>
    %37 = arith.truncf %36 : vector<8x128xf32> to vector<8x128xbf16>
    %c0_22 = arith.constant 0 : index
    %c0_23 = arith.constant 0 : index
    %c0_24 = arith.constant 0 : index
    %c0_25 = arith.constant 0 : index
    %38 = vector.load %arg8[%c0_22, %c0_23, %c0_24, %c0_25] : memref<1x1x8x128xbf16, #tpu.memory_space<vmem>>, vector<1x1x8x128xbf16>
    %39 = vector.shape_cast %38 : vector<1x1x8x128xbf16> to vector<8x128xbf16>
    %40 = vector.shape_cast %37 : vector<8x128xbf16> to vector<1x1x8x128xbf16>
    tpu.vector_store %arg8[%c0_22, %c0_23, %c0_24, %c0_25], %40 {strides = array<i32>} : memref<1x1x8x128xbf16, #tpu.memory_space<vmem>>, vector<1x1x8x128xbf16>,
    return
  }
  func.func @transform_0(%arg0: i32, %arg1: i32) -> (i32, i32, i32, i32) {
    %c0_i32 = arith.constant 0 : i32
    %c0_i32_0 = arith.constant 0 : i32
    %c0_i32_1 = arith.constant 0 : i32
    return %arg0, %arg1, %c0_i32, %c0_i32_0 : i32, i32, i32, i32
  }
  func.func @transform_1(%arg0: i32, %arg1: i32) -> (i32, i32, i32, i32) {
    %c0_i32 = arith.constant 0 : i32
    %c0_i32_0 = arith.constant 0 : i32
    %c0_i32_1 = arith.constant 0 : i32
    return %arg0, %arg1, %c0_i32, %c0_i32_0 : i32, i32, i32, i32
  }
  func.func @transform_2(%arg0: i32, %arg1: i32) -> (i32, i32, i32, i32) {
    %c0_i32 = arith.constant 0 : i32
    %c0_i32_0 = arith.constant 0 : i32
    %c0_i32_1 = arith.constant 0 : i32
    return %arg0, %arg1, %c0_i32, %c0_i32_0 : i32, i32, i32, i32
  }
  func.func @transform_3(%arg0: i32, %arg1: i32) -> (i32, i32) {
    %c0_i32 = arith.constant 0 : i32
    %c0_i32_0 = arith.constant 0 : i32
    %c0_i32_1 = arith.constant 0 : i32
    return %c0_i32, %c0_i32_0 : i32, i32
  }
  func.func @transform_4(%arg0: i32, %arg1: i32) -> (i32, i32) {
    %c0_i32 = arith.constant 0 : i32
    %c0_i32_0 = arith.constant 0 : i32
    %c0_i32_1 = arith.constant 0 : i32
    return %c0_i32, %c0_i32_0 : i32, i32
  }
  func.func @transform_5(%arg0: i32, %arg1: i32) -> (i32, i32) {
    %c0_i32 = arith.constant 0 : i32
    %c0_i32_0 = arith.constant 0 : i32
    %c0_i32_1 = arith.constant 0 : i32
    return %c0_i32, %c0_i32_0 : i32, i32
  }
  func.func @transform_6(%arg0: i32, %arg1: i32) -> (i32, i32, i32, i32) {
    %c0_i32 = arith.constant 0 : i32
    %c0_i32_0 = arith.constant 0 : i32
    %c0_i32_1 = arith.constant 0 : i32
    return %arg0, %arg1, %c0_i32, %c0_i32_0 : i32, i32, i32, i32
  }
}

module attributes {stable_mosaic.version = 11 : i64} {
  func.func @_linear_kernel(%arg0: i32, %arg1: i32, %arg2: i32, %arg3: memref<16x256xbf16, #tpu.memory_space<vmem>>, %arg4: memref<256x256xbf16, #tpu.memory_space<vmem>>, %arg5: memref<16x256xf32, #tpu.memory_space<vmem>>, %arg6: memref<16x256xf32, #tpu.memory_space<vmem>>) attributes {dimension_semantics = [#tpu.dimension_semantics<parallel>, #tpu.dimension_semantics<parallel>, #tpu.dimension_semantics<arbitrary>], iteration_bounds = array<i64: 1, 1, 1>, scalar_prefetch = 0 : i64, scratch_operands = 1 : i64, tpu.core_type = #tpu.core_type<tc>, window_params = [{transform_indices = @transform_0, window_bounds = array<i64: 16, 256>}, {transform_indices = @transform_1, window_bounds = array<i64: 256, 256>}, {transform_indices = @transform_2, window_bounds = array<i64: 16, 256>}]} {
    %c0_i32 = arith.constant 0 : i32
    %0 = arith.cmpi eq, %arg2, %c0_i32 : i32
    %1 = arith.extui %0 : i1 to i32
    %c0_i32_0 = arith.constant 0 : i32
    %2 = arith.cmpi ne, %1, %c0_i32_0 : i32
    scf.if %2 {
      %cst_10 = arith.constant 0.000000e+00 : f32
      %12 = vector.broadcast %cst_10 : f32 to vector<16x256xf32>
      %c0_11 = arith.constant 0 : index
      %c0_12 = arith.constant 0 : index
      %13 = vector.load %arg6[%c0_11, %c0_12] : memref<16x256xf32, #tpu.memory_space<vmem>>, vector<16x256xf32>
      tpu.vector_store %arg6[%c0_11, %c0_12], %12 {strides = array<i32>} : memref<16x256xf32, #tpu.memory_space<vmem>>, vector<16x256xf32>,
    } else {
    }
    %c0 = arith.constant 0 : index
    %c0_1 = arith.constant 0 : index
    %3 = vector.load %arg6[%c0, %c0_1] : memref<16x256xf32, #tpu.memory_space<vmem>>, vector<16x256xf32>
    %c0_2 = arith.constant 0 : index
    %c0_3 = arith.constant 0 : index
    %4 = vector.load %arg3[%c0_2, %c0_3] : memref<16x256xbf16, #tpu.memory_space<vmem>>, vector<16x256xbf16>
    %c0_4 = arith.constant 0 : index
    %c0_5 = arith.constant 0 : index
    %5 = vector.load %arg4[%c0_4, %c0_5] : memref<256x256xbf16, #tpu.memory_space<vmem>>, vector<256x256xbf16>
    %cst = arith.constant dense<0.000000e+00> : vector<16x256xf32>
    %6 = tpu.matmul %4, %5, %cst {dimension_numbers = #tpu.dot_dimension_numbers<[1], [0], [0], [1], [0, 0, 1, 1], [], []>} : vector<16x256xbf16>, vector<256x256xbf16>, vector<16x256xf32> -> vector<16x256xf32>
    %7 = arith.addf %3, %6 : vector<16x256xf32>
    %c0_6 = arith.constant 0 : index
    %c0_7 = arith.constant 0 : index
    %8 = vector.load %arg6[%c0_6, %c0_7] : memref<16x256xf32, #tpu.memory_space<vmem>>, vector<16x256xf32>
    tpu.vector_store %arg6[%c0_6, %c0_7], %7 {strides = array<i32>} : memref<16x256xf32, #tpu.memory_space<vmem>>, vector<16x256xf32>,
    %c0_i32_8 = arith.constant 0 : i32
    %9 = arith.cmpi eq, %arg2, %c0_i32_8 : i32
    %10 = arith.extui %9 : i1 to i32
    %c0_i32_9 = arith.constant 0 : i32
    %11 = arith.cmpi ne, %10, %c0_i32_9 : i32
    scf.if %11 {
      %c0_10 = arith.constant 0 : index
      %c0_11 = arith.constant 0 : index
      %12 = vector.load %arg6[%c0_10, %c0_11] : memref<16x256xf32, #tpu.memory_space<vmem>>, vector<16x256xf32>
      %c0_12 = arith.constant 0 : index
      %c0_13 = arith.constant 0 : index
      %13 = vector.load %arg5[%c0_12, %c0_13] : memref<16x256xf32, #tpu.memory_space<vmem>>, vector<16x256xf32>
      tpu.vector_store %arg5[%c0_12, %c0_13], %12 {strides = array<i32>} : memref<16x256xf32, #tpu.memory_space<vmem>>, vector<16x256xf32>,
    } else {
    }
    return
  }
  func.func @transform_0(%arg0: i32, %arg1: i32, %arg2: i32) -> (i32, i32) {
    %c0_i32 = arith.constant 0 : i32
    return %arg0, %arg2 : i32, i32
  }
  func.func @transform_1(%arg0: i32, %arg1: i32, %arg2: i32) -> (i32, i32) {
    %c0_i32 = arith.constant 0 : i32
    return %arg2, %arg1 : i32, i32
  }
  func.func @transform_2(%arg0: i32, %arg1: i32, %arg2: i32) -> (i32, i32) {
    %c0_i32 = arith.constant 0 : i32
    return %arg0, %arg1 : i32, i32
  }
}

</mosaic_0001>

<bundles_post_ra>
// kernel: _lambda_.3
= control target key start
LH: loop header
LB: loop body
LE: loop exit
PB: predicated region body
PF: predicated region fallthrough
CT: control target
= control target key end

     0   :  { %s1002_s9 = smov 0   ;;  %s1004_s10 = smov 0   ;;  %s1186_s0 = inlined_call_operand.vmem [shape: bf16[16,256], index: 0, kind: input, shape index: {}]   ;;  %s1187_s1 = inlined_call_operand.vmem [shape: bf16[256,768], index: 1, kind: input, shape index: {}]   ;;  %s1188_s2 = inlined_call_operand.vmem [shape: bf16[16,768], index: 2, kind: output, shape index: {}]  }
   0x1   :  { %s1006_s11 = smov 0   ;;  %s1008_s12 = smov 0  }
   0x2   :  { %s1010_s13 = smov 0  }
   0x3 LB: > { %s27_s14 = sadd.s32 1, %s981_s12  ;;  %s800_s15 = sadd.s32 4294967295, %s985_s13   ;;  %s985_s13 = sphi %s1010_s13, %s12_s13   ;;  %s981_s12 = sphi %s1008_s12, %s1193_s12   ;;  %s977_s11 = sphi %s1006_s11, %s1192_s11   ;;  %s973_s10 = sphi %s1004_s10, %s1191_s10   ;;  %s969_s9 = sphi %s1002_s9, %s1190_s9  }
   0x4   : > { %p29_p0 = scmp.ge.s32.totalorder %s27_s14, 3  ;;  %p75_p1 = scmp.ne.s32.totalorder %s973_s10, %s969_s9 }
   0x5   : > { %p76_p2 = scmp.eq.s32.totalorder %s985_s13, 0  ;;  %p107_p4 = scmp.eq.s32.totalorder %s800_s15, 2 }
   0x6   : > { %s1195_s14 = smov (%p29_p0, %s27_s14), 0  ;;  %s68_s17 = sadd.s32 1, %s973_s10 }
   0x7   : > { %p77_p3 = por %p76_p2, %p75_p1  ;;  %s64_s16 = ssub.s32 %s981_s12, %s1195_s14 }
   0x8   : > { %p66_p5 = scmp.eq.s32.totalorder %s64_s16, 0  ;;  %p1037_p6 = por %p107_p4, %p75_p1 }
   0x9   : > { %p804_p7 = scmp.ge.s32.totalorder %s985_s13, 3 }
   0xa   : > { %s1042_s19 = scalar_select %p66_p5, %s973_s10, %s68_s17  }
   0xb   : > { %144 = sbr.rel (%p804_p7) target bundleno = 38 (0x26), region = 20 }
  0x12   : > { %147 = sbr.rel (!%p77_p3) target bundleno = 38 (0x26), region = 24  ;;  %s149_s20 = sand.u32 (%p77_p3), 1, %s973_s10  }
  0x13   : > { %s852_s21 = sshll.u32 (%p77_p3), %s981_s12, 3  ;;  %s805_s22 = sshll.u32 (%p77_p3), %s149_s20, 8 }
  0x14   : > { %s1050_s25 = scalar_lea.vmem (%p77_p3), %s1187_s1, %s852_s21  ;;  %s1055_s26 = scalar_lea.vmem (%p77_p3), [#allocation3], %s805_s22 }
  0x15   : > { %v247_v0 = vld [vmem:[%s1050_s25] sm:$0xff] (%p77_p3)  ;;  %v249_v1 = vld [vmem:[%s1050_s25 + $0x18] sm:$0xff] (%p77_p3)  ;;  %v251_v2 = vld [vmem:[%s1050_s25 + $0x30] sm:$0xff] (%p77_p3) }
  0x16   : > { %248 = vst [vmem:[%s1055_s26] sm:$0xff] (%p77_p3), %v247_v0  ;;  %250 = vst [vmem:[%s1055_s26 + $0x8] sm:$0xff] (%p77_p3), %v249_v1  ;;  %v253_v3 = vld [vmem:[%s1050_s25 + $0x48] sm:$0xff] (%p77_p3)  ;;  %v255_v4 = vld [vmem:[%s1050_s25 + $0x60] sm:$0xff] (%p77_p3) }
  0x17   : > { %252 = vst [vmem:[%s1055_s26 + $0x10] sm:$0xff] (%p77_p3), %v251_v2  ;;  %v257_v5 = vld [vmem:[%s1050_s25 + $0x78] sm:$0xff] (%p77_p3)  ;;  %254 = vst [vmem:[%s1055_s26 + $0x18] sm:$0xff] (%p77_p3), %v253_v3  ;;  %v259_v6 = vld [vmem:[%s1050_s25 + $0x90] sm:$0xff] (%p77_p3) }
  0x18   : > { %256 = vst [vmem:[%s1055_s26 + $0x20] sm:$0xff] (%p77_p3), %v255_v4  ;;  %258 = vst [vmem:[%s1055_s26 + $0x28] sm:$0xff] (%p77_p3), %v257_v5  ;;  %v261_v7 = vld [vmem:[%s1050_s25 + $0xa8] sm:$0xff] (%p77_p3)  ;;  %v263_v8 = vld [vmem:[%s1050_s25 + $0xc0] sm:$0xff] (%p77_p3) }
  0x19   : > { %260 = vst [vmem:[%s1055_s26 + $0x30] sm:$0xff] %v259_v6  ;;  %262 = vst [vmem:[%s1055_s26 + $0x38] sm:$0xff] %v261_v7  ;;  %v265_v9 = vld [vmem:[%s1050_s25 + $0xd8] sm:$0xff]  ;;  %v267_v10 = vld [vmem:[%s1050_s25 + $0xf0] sm:$0xff] }
  0x1a   : > { %264 = vst [vmem:[%s1055_s26 + $0x40] sm:$0xff] %v263_v8  ;;  %v269_v11 = vld [vmem:[%s1050_s25 + $0x108] sm:$0xff]  ;;  %266 = vst [vmem:[%s1055_s26 + $0x48] sm:$0xff] %v265_v9  ;;  %v271_v12 = vld [vmem:[%s1050_s25 + $0x120] sm:$0xff] }
  0x1b   : > { %268 = vst [vmem:[%s1055_s26 + $0x50] sm:$0xff] %v267_v10  ;;  %270 = vst [vmem:[%s1055_s26 + $0x58] sm:$0xff] %v269_v11  ;;  %v273_v13 = vld [vmem:[%s1050_s25 + $0x138] sm:$0xff]  ;;  %v275_v14 = vld [vmem:[%s1050_s25 + $0x150] sm:$0xff] }
  0x1c   : > { %272 = vst [vmem:[%s1055_s26 + $0x60] sm:$0xff] %v271_v12  ;;  %274 = vst [vmem:[%s1055_s26 + $0x68] sm:$0xff] %v273_v13  ;;  %v277_v15 = vld [vmem:[%s1050_s25 + $0x168] sm:$0xff]  ;;  %v279_v16 = vld [vmem:[%s1050_s25 + $0x180] sm:$0xff] }
  0x1d   : > { %276 = vst [vmem:[%s1055_s26 + $0x70] sm:$0xff] %v275_v14  ;;  %v281_v17 = vld [vmem:[%s1050_s25 + $0x198] sm:$0xff]  ;;  %278 = vst [vmem:[%s1055_s26 + $0x78] sm:$0xff] %v277_v15  ;;  %v283_v18 = vld [vmem:[%s1050_s25 + $0x1b0] sm:$0xff] }
  0x1e   : > { %280 = vst [vmem:[%s1055_s26 + $0x80] sm:$0xff] %v279_v16  ;;  %282 = vst [vmem:[%s1055_s26 + $0x88] sm:$0xff] %v281_v17  ;;  %v285_v19 = vld [vmem:[%s1050_s25 + $0x1c8] sm:$0xff]  ;;  %v287_v20 = vld [vmem:[%s1050_s25 + $0x1e0] sm:$0xff] }
  0x1f   : > { %284 = vst [vmem:[%s1055_s26 + $0x90] sm:$0xff] %v283_v18  ;;  %286 = vst [vmem:[%s1055_s26 + $0x98] sm:$0xff] %v285_v19  ;;  %v289_v21 = vld [vmem:[%s1050_s25 + $0x1f8] sm:$0xff]  ;;  %v291_v22 = vld [vmem:[%s1050_s25 + $0x210] sm:$0xff] }
  0x20   : > { %288 = vst [vmem:[%s1055_s26 + $0xa0] sm:$0xff] %v287_v20  ;;  %v293_v23 = vld [vmem:[%s1050_s25 + $0x228] sm:$0xff]  ;;  %290 = vst [vmem:[%s1055_s26 + $0xa8] sm:$0xff] %v289_v21  ;;  %v295_v24 = vld [vmem:[%s1050_s25 + $0x240] sm:$0xff] }
  0x21   : > { %292 = vst [vmem:[%s1055_s26 + $0xb0] sm:$0xff] %v291_v22  ;;  %294 = vst [vmem:[%s1055_s26 + $0xb8] sm:$0xff] %v293_v23  ;;  %v297_v25 = vld [vmem:[%s1050_s25 + $0x258] sm:$0xff]  ;;  %v299_v26 = vld [vmem:[%s1050_s25 + $0x270] sm:$0xff] }
  0x22   : > { %296 = vst [vmem:[%s1055_s26 + $0xc0] sm:$0xff] %v295_v24  ;;  %298 = vst [vmem:[%s1055_s26 + $0xc8] sm:$0xff] %v297_v25  ;;  %v301_v27 = vld [vmem:[%s1050_s25 + $0x288] sm:$0xff]  ;;  %v303_v28 = vld [vmem:[%s1050_s25 + $0x2a0] sm:$0xff] }
  0x23   : > { %300 = vst [vmem:[%s1055_s26 + $0xd0] sm:$0xff] %v299_v26  ;;  %v305_v29 = vld [vmem:[%s1050_s25 + $0x2b8] sm:$0xff]  ;;  %302 = vst [vmem:[%s1055_s26 + $0xd8] sm:$0xff] %v301_v27  ;;  %v307_v30 = vld [vmem:[%s1050_s25 + $0x2d0] sm:$0xff] }
  0x24   : > { %304 = vst [vmem:[%s1055_s26 + $0xe0] sm:$0xff] %v303_v28  ;;  %306 = vst [vmem:[%s1055_s26 + $0xe8] sm:$0xff] %v305_v29  ;;  %v309_v31 = vld [vmem:[%s1050_s25 + $0x2e8] sm:$0xff] }
  0x25   : > { %308 = vst [vmem:[%s1055_s26 + $0xf0] sm:$0xff] %v307_v30  ;;  %310 = vst [vmem:[%s1055_s26 + $0xf8] sm:$0xff] %v309_v31 }
  0x26 PF: > { %p808_p8 = scmp.ge.s32.totalorder %s985_s13, 1  ;;  %p315_p9 = scmp.lt.s32.totalorder %s985_s13, 4 }
  0x28   : > { %p316_p10 = pnand %p808_p8, %p315_p9 }
  0x29   : > { %s322_s27 = sand.u32 (!%p316_p10), 1, %s969_s9   ;;  %v946_v32 = vld [vmem:[%s1186_s0 + $0x4] ss:$8 sps:$4 sm:$0xff] (!%p316_p10)   ;;  %v944_v1 = vld [vmem:[%s1186_s0] ss:$8 sps:$4 sm:$0xff] (!%p316_p10)  }
  0x2a   : > { %319 = sbr.rel (%p316_p10) target bundleno = 335 (0x14f), region = 62  ;;  %s809_s28 = sshll.u32 (!%p316_p10), %s322_s27, 8  ;;  %616 = vmatprep.mubr.bf16.mxu0 (!%p316_p10), %v946_v32 }
  0x2b   : > { %s1126_s3 = scalar_lea.vmem (!%p316_p10), [#allocation3], %s809_s28  ;;  %s810_s6 = sshll.u32 (!%p316_p10), %s322_s27, 4 }
  0x2c   : > { %v896_v33 = vld [vmem:[%s1126_s3 + $0x4] ss:$8 sps:$4 sm:$0xff] (!%p316_p10)   ;;  %v898_v34 = vld [vmem:[%s1126_s3] ss:$8 sps:$4 sm:$0xff] (!%p316_p10)   ;;  %v899_v35 = vld [vmem:[%s1126_s3 + $0x14] ss:$8 sps:$4 sm:$0xff] (!%p316_p10)  }
  0x2d   : > { %584 = vmatprep.subr.bf16.mxu0 (!%p316_p10), %v896_v33  ;;  %v901_v36 = vld [vmem:[%s1126_s3 + $0x10] ss:$8 sps:$4 sm:$0xff] (!%p316_p10)   ;;  %v902_v37 = vld [vmem:[%s1126_s3 + $0x24] ss:$8 sps:$4 sm:$0xff] (!%p316_p10)   ;;  %v904_v38 = vld [vmem:[%s1126_s3 + $0x20] ss:$8 sps:$4 sm:$0xff] (!%p316_p10)  }
  0x2e   : > { %585 = vmatpush1.bf16.msra.mxu0 (!%p316_p10), %v898_v34  ;;  %v905_v39 = vld [vmem:[%s1126_s3 + $0x34] ss:$8 sps:$4 sm:$0xff] (!%p316_p10)   ;;  %v907_v40 = vld [vmem:[%s1126_s3 + $0x30] ss:$8 sps:$4 sm:$0xff] (!%p316_p10)   ;;  %v908_v41 = vld [vmem:[%s1126_s3 + $0x44] ss:$8 sps:$4 sm:$0xff] (!%p316_p10)  }
  0x2f   : > { %586 = vmatprep.subr.bf16.mxu0 (!%p316_p10), %v899_v35  ;;  %v910_v42 = vld [vmem:[%s1126_s3 + $0x40] ss:$8 sps:$4 sm:$0xff] (!%p316_p10)   ;;  %v911_v43 = vld [vmem:[%s1126_s3 + $0x54] ss:$8 sps:$4 sm:$0xff] (!%p316_p10)   ;;  %v913_v44 = vld [vmem:[%s1126_s3 + $0x50] ss:$8 sps:$4 sm:$0xff] (!%p316_p10)  }
  0x30   : > { %v914_v45 = vld [vmem:[%s1126_s3 + $0x64] ss:$8 sps:$4 sm:$0xff] (!%p316_p10)   ;;  %v916_v46 = vld [vmem:[%s1126_s3 + $0x60] ss:$8 sps:$4 sm:$0xff] (!%p316_p10)   ;;  %v917_v47 = vld [vmem:[%s1126_s3 + $0x74] ss:$8 sps:$4 sm:$0xff] (!%p316_p10)  }
  0x31   : > { %v919_v48 = vld [vmem:[%s1126_s3 + $0x70] ss:$8 sps:$4 sm:$0xff]   ;;  %v920_v49 = vld [vmem:[%s1126_s3 + $0x84] ss:$8 sps:$4 sm:$0xff]   ;;  %v922_v50 = vld [vmem:[%s1126_s3 + $0x80] ss:$8 sps:$4 sm:$0xff]  }
  0x32   : > { %587 = vmatpush1.bf16.msra.mxu0 %v901_v36  ;;  %v923_v51 = vld [vmem:[%s1126_s3 + $0x94] ss:$8 sps:$4 sm:$0xff]   ;;  %v925_v52 = vld [vmem:[%s1126_s3 + $0x90] ss:$8 sps:$4 sm:$0xff]   ;;  %v926_v53 = vld [vmem:[%s1126_s3 + $0xa4] ss:$8 sps:$4 sm:$0xff]  }
  0x33   : > { %588 = vmatprep.subr.bf16.mxu0 %v902_v37  ;;  %v928_v54 = vld [vmem:[%s1126_s3 + $0xa0] ss:$8 sps:$4 sm:$0xff]   ;;  %v929_v55 = vld [vmem:[%s1126_s3 + $0xb4] ss:$8 sps:$4 sm:$0xff]   ;;  %v931_v56 = vld [vmem:[%s1126_s3 + $0xb0] ss:$8 sps:$4 sm:$0xff]  }
  0x34   : > { %v932_v57 = vld [vmem:[%s1126_s3 + $0xc4] ss:$8 sps:$4 sm:$0xff]   ;;  %v934_v58 = vld [vmem:[%s1126_s3 + $0xc0] ss:$8 sps:$4 sm:$0xff]   ;;  %v935_v59 = vld [vmem:[%s1126_s3 + $0xd4] ss:$8 sps:$4 sm:$0xff]  }
  0x35   : > { %v937_v60 = vld [vmem:[%s1126_s3 + $0xd0] ss:$8 sps:$4 sm:$0xff]   ;;  %v938_v61 = vld [vmem:[%s1126_s3 + $0xe4] ss:$8 sps:$4 sm:$0xff]   ;;  %v940_v62 = vld [vmem:[%s1126_s3 + $0xe0] ss:$8 sps:$4 sm:$0xff]  }
  0x36   : > { %589 = vmatpush1.bf16.msra.mxu0 %v904_v38  ;;  %v941_v63 = vld [vmem:[%s1126_s3 + $0xf4] ss:$8 sps:$4 sm:$0xff]   ;;  %v943_v0 = vld [vmem:[%s1126_s3 + $0xf0] ss:$8 sps:$4 sm:$0xff]   ;;  %s351_s7 = scalar_lea.vmem [#allocation4], %s810_s6  ;;  %s855_s8 = sshll.u32 (%p1037_p6), %s977_s11, 3 }
  0x37   : > { %590 = vmatprep.subr.bf16.mxu0 %v905_v39  ;;  %s668_s9 = scalar_lea.vmem (%p1037_p6), %s1188_s2, %s855_s8 }
  0x3a   : > { %591 = vmatpush1.bf16.msra.mxu0 %v907_v40 }
  0x3b   : > { %592 = vmatprep.subr.bf16.mxu0 %v908_v41 }
  0x3e   : > { %593 = vmatpush1.bf16.msra.mxu0 %v910_v42 }
  0x3f   : > { %594 = vmatprep.subr.bf16.mxu0 %v911_v43 }
  0x42   : > { %595 = vmatpush1.bf16.msra.mxu0 %v913_v44 }
  0x43   : > { %596 = vmatprep.subr.bf16.mxu0 %v914_v45 }
  0x46   : > { %597 = vmatpush1.bf16.msra.mxu0 %v916_v46 }
  0x47   : > { %598 = vmatprep.subr.bf16.mxu0 %v917_v47 }
  0x4a   : > { %599 = vmatpush1.bf16.msra.mxu0 %v919_v48 }
  0x4b   : > { %600 = vmatprep.subr.bf16.mxu0 %v920_v49 }
  0x4e   : > { %601 = vmatpush1.bf16.msra.mxu0 %v922_v50 }
  0x4f   : > { %602 = vmatprep.subr.bf16.mxu0 %v923_v51 }
  0x52   : > { %603 = vmatpush1.bf16.msra.mxu0 %v925_v52 }
  0x53   : > { %604 = vmatprep.subr.bf16.mxu0 %v926_v53 }
  0x56   : > { %605 = vmatpush1.bf16.msra.mxu0 %v928_v54 }
  0x57   : > { %606 = vmatprep.subr.bf16.mxu0 %v929_v55 }
  0x5a   : > { %607 = vmatpush1.bf16.msra.mxu0 %v931_v56 }
  0x5b   : > { %608 = vmatprep.subr.bf16.mxu0 %v932_v57 }
  0x5e   : > { %609 = vmatpush1.bf16.msra.mxu0 %v934_v58 }
  0x5f   : > { %610 = vmatprep.subr.bf16.mxu0 %v935_v59 }
  0x62   : > { %611 = vmatpush1.bf16.msra.mxu0 %v937_v60 }
  0x63   : > { %612 = vmatprep.subr.bf16.mxu0 %v938_v61 }
  0x66   : > { %613 = vmatpush1.bf16.msra.mxu0 %v940_v62 }
  0x67   : > { %614 = vmatprep.subr.bf16.mxu0 %v941_v63 }
  0x6a   : > { %615 = vmatpush1.bf16.msra.mxu0 %v943_v0 }
  0x6d   : > { %617 = vmatmul.mubr.bf16.vlgmr.msra.gmra.mrb[0].mxu0 %v944_v1 }
 0x140   : > { %v618_v2 = vpop.f32.mrb[0].mxu0  ;;  %662 = sbr.rel (!%p1037_p6) target bundleno = 335 (0x14f), region = 78 }
 0x141   : > { %v620_v3 = vpop.f32.mrb[1].mxu0 }
 0x142   : > { %v853_v4 = vpack.c.bf16 %v620_v3, %v618_v2  ;;  %v622_v5 = vpop.f32.mrb[2].mxu0 }
 0x143   : > { %v624_v6 = vpop.f32.mrb[3].mxu0 }
 0x144   : > { %654 = vst [vmem:[%s351_s7] sm:$0xff] %v853_v4  ;;  %v854_v7 = vpack.c.bf16 %v624_v6, %v622_v5 }
 0x146   : > { %655 = vst [vmem:[%s351_s7 + $0x8] sm:$0xff] %v854_v7 }
 0x14b   : > { %v698_v8 = vld [vmem:[%s351_s7] sm:$0xff] }
 0x14c   : > { %699 = vst [vmem:[%s668_s9] sm:$0xff] %v698_v8 }
 0x14d   : > { %v700_v9 = vld [vmem:[%s351_s7 + $0x8] sm:$0xff] }
 0x14e   : > { %701 = vst [vmem:[%s668_s9 + $0x18] sm:$0xff] %v700_v9 }
 0x14f PF: > { %s12_s13 = sadd.s32 1, %s985_s13   ;;  %s1190_s9 = smov %s973_s10 }
 0x150   : > { %p9_p11 = scmp.ge.s32.totalorder %s12_s13, 5   ;;  %s1191_s10 = smov %s1042_s19 }
 0x151   : > { %s1192_s11 = smov %s981_s12  ;;  %s1193_s12 = smov %s1195_s14 }
 0x152   :  { %11 = sbr.rel (!%p9_p11) target bundleno = 3 (0x3), region = 150 }

// kernel: _lambda_.4
= control target key start
LH: loop header
LB: loop body
LE: loop exit
PB: predicated region body
PF: predicated region fallthrough
CT: control target
= control target key end

     0   :  { %s749_s21 = smov 0   ;;  %s751_s22 = smov 0   ;;  %s824_s0 = inlined_call_operand.vmem [shape: bf16[2,2,8,128], index: 0, kind: input, shape index: {}]   ;;  %s825_s1 = inlined_call_operand.vmem [shape: bf16[2,2,8,128], index: 1, kind: input, shape index: {}]   ;;  %s826_s2 = inlined_call_operand.vmem [shape: bf16[2,2,8,128], index: 2, kind: input, shape index: {}]   ;;  %s827_s3 = inlined_call_operand.vmem [shape: f32[8,128], index: 3, kind: input, shape index: {}]   ;;  %s828_s4 = inlined_call_operand.vmem [shape: f32[8,128], index: 4, kind: input, shape index: {}]   ;;  %s829_s5 = inlined_call_operand.vmem [shape: f32[8,8], index: 5, kind: input, shape index: {}]   ;;  %s830_s6 = inlined_call_operand.vmem [shape: bf16[2,2,8,128], index: 6, kind: output, shape index: {}]  }
   0x1   :  { %s753_s23 = smov 0   ;;  %s755_s24 = smov 0  }
   0x2   :  { %s757_s25 = smov 0  }
   0x3 LB: > { %s25_s26 = sadd.s32 1, %s701_s23  ;;  %s28_s27 = sadd.s32 1, %s705_s24  ;;  %s709_s25 = sphi %s757_s25, %s16_s25   ;;  %s705_s24 = sphi %s755_s24, %s834_s24   ;;  %s701_s23 = sphi %s753_s23, %s833_s23   ;;  %s697_s22 = sphi %s751_s22, %s832_s22   ;;  %s693_s21 = sphi %s749_s21, %s831_s21  }
   0x4   : > { %p26_p0 = scmp.ge.s32.totalorder %s25_s26, 2  ;;  %p596_p1 = scmp.ge.s32.totalorder %s709_s25, 1 }
   0x5   : > { %p261_p2 = scmp.lt.s32.totalorder %s709_s25, 5 }
   0x6   : > { %s836_s26 = smov (%p26_p0, %s25_s26), 0  ;;  %s838_s27 = smov (!%p26_p0, %s28_s27), %s705_s24 }
   0x7   : > { %p262_p3 = pnand %p596_p1, %p261_p2  ;;  %p30_p4 = scmp.ge.s32.totalorder %s838_s27, 2 }
   0x8   : > { %p313_p5 = scmp.lt.s32.totalorder (!%p262_p3), %s697_s22, 1  ;;  %p315_p6 = scmp.lt.s32.totalorder (!%p262_p3), %s693_s21, 1  ;;  %v711_v0 = vmov (!%p262_p3), 0.0   ;;  %vm712_vm0 = vmmov (!%p262_p3), 0   ;;  %v346_v5 = vld [vmem:[%s827_s3] sm:$0xff] (!%p262_p3)  ;;  %vm407_vm1 = vcmask (!%p262_p3), 64512  }
   0x9   : > { %s840_s27 = smov (%p30_p4, %s838_s27), 0  ;;  %265 = sbr.rel (%p262_p3) target bundleno = 745 (0x2e9), region = 44 }
   0xa   : > { %612 = vmatprep.subr.bf16.mxu0 (!%p262_p3), %v711_v0  ;;  %618 = vmatprep.subr.bf16.mxu1 (!%p262_p3), %v711_v0  ;;  %s713_s13 = smov (!%p262_p3), 64   ;;  %v347_v6 = vld [vmem:[%s828_s4] sm:$0xff] (!%p262_p3)  ;;  %vm422_vm2 = vcmask (!%p262_p3), 1043456  }
   0xb   : > { %614 = vmatprep.mubr.msk.bf16.mxu0 (!%p262_p3), %vm712_vm0, %v711_v0  ;;  %620 = vmatprep.mubr.msk.bf16.mxu1 (!%p262_p3), %vm712_vm0, %v711_v0  ;;  %v405_v18 = vld [vmem:[%s829_s5] sm:$0xff] (!%p262_p3) }
  0x10   : > { %s842_s22 = smov (!%p313_p5, %s697_s22), 1  ;;  %s844_s21 = smov (!%p315_p6, %s693_s21), 1 }
  0x11   : > { %s597_s28 = sshll.u32 %s842_s22, 1 }
  0x12   : > { %s318_s29 = sadd.s32 %s597_s28, %s844_s21 }
  0x13   : > { %s779_s30 = sshll.u32 %s318_s29, 2 }
  0x14   : > { %s328_s9 = scalar_lea.vmem %s825_s1, %s779_s30  ;;  %s320_s12 = scalar_lea.vmem %s824_s0, %s779_s30 }
  0x15   : > { %v356_v1 = vld [vmem:[%s328_s9] sm:$0xf]  ;;  %s336_s22 = scalar_lea.vmem %s826_s2, %s779_s30  ;;  %s344_s7 = scalar_lea.vmem %s830_s6, %s779_s30 }
  0x16   : > { %v348_v2 = vld [vmem:[%s320_s12] sm:$0xf]  ;;  %v357_v3 = vunpack.c.l.bf16 %v356_v1 }
  0x17   : > { %v349_v4 = vunpack.c.l.bf16 %v348_v2  ;;  %v418_v25 = vld [vmem:[%s336_s22] sm:$0xf] }
  0x18   : > { %359 = vrot.lane.b32.xlu0 %v357_v3, %s713_s13  ;;  %v358_v7 = vmul.f32 %v357_v3, %v346_v5  ;;  %v424_v26 = vsel %vm422_vm2, %v418_v25, 0 }
  0x19   : > { %v350_v11 = vmul.f32 %v349_v4, %v346_v5  ;;  %619 = vmatpush3.bf16.msra.mxu1 %v424_v26 }
  0x1c   : > { %351 = vrot.lane.b32.xlu0 %v349_v4, %s713_s13 }
  0x8a   : > { %v360_v8 = vpop.permute.xlu0 %359 }
  0x8b   : > { %v361_v9 = vmul.f32 %v360_v8, %v347_v6 }
  0x8d   : > { %v362_v10 = vadd.f32 %v361_v9, %v358_v7 }
  0x8e   : > { %v352_v12 = vpop.permute.xlu0 %351 }
  0x8f   : > { %v363_v13 = vpack.c.bf16 %v362_v10, %v362_v10  ;;  %v353_v14 = vmul.f32 %v352_v12, %v347_v6 }
  0x91   : > { %613 = vmatpush3.bf16.xpose.msra.mxu0 %v363_v13  ;;  %v354_v15 = vadd.f32 %v353_v14, %v350_v11 }
  0x93   : > { %v355_v16 = vpack.c.bf16 %v354_v15, %v354_v15 }
  0x98   : > { %615 = vmatmul.mubr.bf16.vlgmr.msra.gmra.mrb[0].mxu0 %v355_v16 }
 0x16b   : > { %v398_v17 = vpop.f32.mrb[0].mxu0 }
 0x16c   : > { %v404_v19 = vmul.f32 0.0625, %v398_v17  ;;  %v616_v20 = vpop.f32.mrb[1].mxu0 }
 0x16d   : > { %v401_v21 = vpop.f32.mrb[2].mxu0 }
 0x16e   : > { %v617_v22 = vpop.f32.mrb[3].mxu0  ;;  %v406_v23 = vadd.f32 %v405_v18, %v404_v19 }
 0x170   : > { %v408_v24 = vsel %vm407_vm1, %v406_v23, -inf }
 0x171   : > { %409 = vmax.xlane.f32.xlu1 %v408_v24 }
 0x1fe   : > { %v410_v27 = vpop.xlane.xlu1 %409 }
 0x1ff   : > { %v411_v28 = vsub.f32 %v406_v23, %v410_v27 }
 0x201   : > { %v412_v29 = vmul.f32 1.442695, %v411_v28 }
 0x203   : > { %667 = vpow2.f32 %v412_v29 }
 0x20d   : > { %v668_v30 = vpop.eup %667 }
 0x20e   : > { %v414_v31 = vsel %vm407_vm1, %v668_v30, 0.0  ;;  %v417_v32 = vpack.c.bf16 %v668_v30, %v668_v30 }
 0x20f   : > { %415 = vadd.xlane.f32.xlu1 %v414_v31 }
 0x210   : > { %621 = vmatmul.mubr.msk.bf16.vlgmr.msra.gmra.mrb[0].mxu1 %vm407_vm1, %v417_v32 }
 0x29c   : > { %v416_v33 = vpop.xlane.xlu1 %415 }
 0x29d   : > { %669 = vrcp.f32 %v416_v33 }
 0x2a7   : > { %v670_v34 = vpop.eup %669 }
 0x2e3   : > { %v460_v35 = vpop.f32.mrb[0].mxu1 }
 0x2e4   : > { %v467_v36 = vmul.f32 %v670_v34, %v460_v35  ;;  %v622_v37 = vpop.f32.mrb[1].mxu1 }
 0x2e5   : > { %v463_v38 = vpop.f32.mrb[2].mxu1 }
 0x2e6   : > { %v468_v39 = vpack.c.bf16 %v467_v36, %v467_v36  ;;  %v623_v40 = vpop.f32.mrb[3].mxu1 }
 0x2e8   : > { %469 = vst [vmem:[%s344_s7] sm:$0xf] %v468_v39 }
 0x2e9 PF: > { %s16_s25 = sadd.s32 1, %s709_s25   ;;  %s831_s21 = smov %s701_s23 }
 0x2ea   : > { %p13_p7 = scmp.ge.s32.totalorder %s16_s25, 6   ;;  %s832_s22 = smov %s705_s24 }
 0x2eb   : > { %s833_s23 = smov %s836_s26  ;;  %s834_s24 = smov %s840_s27 }
 0x2ec   :  { %15 = sbr.rel (!%p13_p7) target bundleno = 3 (0x3), region = 80 }

// kernel: _lambda_.5
= control target key start
LH: loop header
LB: loop body
LE: loop exit
PB: predicated region body
PF: predicated region fallthrough
CT: control target
= control target key end

     0   :  { %s550_s0 = inlined_call_operand.vmem [shape: bf16[16,256], index: 0, kind: input, shape index: {}]   ;;  %s551_s1 = inlined_call_operand.vmem [shape: bf16[256,256], index: 1, kind: input, shape index: {}]   ;;  %s552_s2 = inlined_call_operand.hbm [shape: f32[16,256], index: 2, kind: output, shape index: {}]  }
   0x1   :  { %v343_v0 = vld [vmem:[%s551_s1 + $0x4] ss:$8 sps:$4 sm:$0xff]   ;;  %v345_v1 = vld [vmem:[%s551_s1] ss:$8 sps:$4 sm:$0xff]   ;;  %v346_v2 = vld [vmem:[%s551_s1 + $0x14] ss:$8 sps:$4 sm:$0xff]  }
   0x2   :  { %228 = vmatprep.subr.bf16.mxu0 %v343_v0  ;;  %v348_v3 = vld [vmem:[%s551_s1 + $0x10] ss:$8 sps:$4 sm:$0xff]   ;;  %v349_v4 = vld [vmem:[%s551_s1 + $0x24] ss:$8 sps:$4 sm:$0xff]   ;;  %v351_v5 = vld [vmem:[%s551_s1 + $0x20] ss:$8 sps:$4 sm:$0xff]  }
   0x3   :  { %229 = vmatpush1.bf16.msra.mxu0 %v345_v1  ;;  %v352_v6 = vld [vmem:[%s551_s1 + $0x34] ss:$8 sps:$4 sm:$0xff]   ;;  %v354_v7 = vld [vmem:[%s551_s1 + $0x30] ss:$8 sps:$4 sm:$0xff]   ;;  %v355_v8 = vld [vmem:[%s551_s1 + $0x44] ss:$8 sps:$4 sm:$0xff]  }
   0x4   :  { %230 = vmatprep.subr.bf16.mxu0 %v346_v2  ;;  %v357_v9 = vld [vmem:[%s551_s1 + $0x40] ss:$8 sps:$4 sm:$0xff]   ;;  %v358_v10 = vld [vmem:[%s551_s1 + $0x54] ss:$8 sps:$4 sm:$0xff]   ;;  %v360_v11 = vld [vmem:[%s551_s1 + $0x50] ss:$8 sps:$4 sm:$0xff]  }
   0x5   :  { %v361_v12 = vld [vmem:[%s551_s1 + $0x64] ss:$8 sps:$4 sm:$0xff]  }
   0x6   :  { %v393_v13 = vld [vmem:[%s550_s0 + $0x4] ss:$8 sps:$4 sm:$0xff]  }
   0x7   :  { %231 = vmatpush1.bf16.msra.mxu0 %v348_v3 }
   0x8   :  { %232 = vmatprep.subr.bf16.mxu0 %v349_v4 }
   0xb   :  { %233 = vmatpush1.bf16.msra.mxu0 %v351_v5 }
   0xc   :  { %234 = vmatprep.subr.bf16.mxu0 %v352_v6 }
   0xf   :  { %235 = vmatpush1.bf16.msra.mxu0 %v354_v7 }
  0x10   :  { %236 = vmatprep.subr.bf16.mxu0 %v355_v8 }
  0x13   :  { %237 = vmatpush1.bf16.msra.mxu0 %v357_v9 }
  0x14   :  { %238 = vmatprep.subr.bf16.mxu0 %v358_v10 }
  0x15   :  { %7 = vsyncpa [#allocation4], 0  ;;  %v363_v14 = vld [vmem:[%s551_s1 + $0x60] ss:$8 sps:$4 sm:$0xff]   ;;  %v364_v15 = vld [vmem:[%s551_s1 + $0x74] ss:$8 sps:$4 sm:$0xff]   ;;  %260 = vmatprep.mubr.bf16.mxu0 %v393_v13 }
  0x16   :  { %v366_v16 = vld [vmem:[%s551_s1 + $0x70] ss:$8 sps:$4 sm:$0xff]   ;;  %v367_v17 = vld [vmem:[%s551_s1 + $0x84] ss:$8 sps:$4 sm:$0xff]   ;;  %v369_v18 = vld [vmem:[%s551_s1 + $0x80] ss:$8 sps:$4 sm:$0xff]  }
  0x17   :  { %239 = vmatpush1.bf16.msra.mxu0 %v360_v11  ;;  %v370_v19 = vld [vmem:[%s551_s1 + $0x94] ss:$8 sps:$4 sm:$0xff]   ;;  %v372_v20 = vld [vmem:[%s551_s1 + $0x90] ss:$8 sps:$4 sm:$0xff]   ;;  %v373_v21 = vld [vmem:[%s551_s1 + $0xa4] ss:$8 sps:$4 sm:$0xff]  }
  0x18   :  { %240 = vmatprep.subr.bf16.mxu0 %v361_v12  ;;  %v375_v22 = vld [vmem:[%s551_s1 + $0xa0] ss:$8 sps:$4 sm:$0xff]   ;;  %v376_v23 = vld [vmem:[%s551_s1 + $0xb4] ss:$8 sps:$4 sm:$0xff]   ;;  %v378_v24 = vld [vmem:[%s551_s1 + $0xb0] ss:$8 sps:$4 sm:$0xff]  }
  0x19   :  { %v379_v25 = vld [vmem:[%s551_s1 + $0xc4] ss:$8 sps:$4 sm:$0xff]   ;;  %v381_v26 = vld [vmem:[%s551_s1 + $0xc0] ss:$8 sps:$4 sm:$0xff]   ;;  %v382_v27 = vld [vmem:[%s551_s1 + $0xd4] ss:$8 sps:$4 sm:$0xff]  }
  0x1a   :  { %v384_v28 = vld [vmem:[%s551_s1 + $0xd0] ss:$8 sps:$4 sm:$0xff]   ;;  %v385_v29 = vld [vmem:[%s551_s1 + $0xe4] ss:$8 sps:$4 sm:$0xff]   ;;  %v387_v30 = vld [vmem:[%s551_s1 + $0xe0] ss:$8 sps:$4 sm:$0xff]  }
  0x1b   :  { %241 = vmatpush1.bf16.msra.mxu0 %v363_v14  ;;  %v388_v31 = vld [vmem:[%s551_s1 + $0xf4] ss:$8 sps:$4 sm:$0xff]   ;;  %v390_v32 = vld [vmem:[%s551_s1 + $0xf0] ss:$8 sps:$4 sm:$0xff]   ;;  %v391_v33 = vld [vmem:[%s550_s0] ss:$8 sps:$4 sm:$0xff]  }
  0x1c   :  { %242 = vmatprep.subr.bf16.mxu0 %v364_v15  ;;  %s418_s21 = smov [#allocation3]  }
  0x1d   :  { %s295_s22 = sshll.u32 %s418_s21, 4  ;;  %s296_s22 = int_to_ptr.vmem [resolvable:$true] %s295_s22 }
  0x1e   :  { %s394_s23 = scalar_lea.vmem %s296_s22, 512  ;;  %p399_p1 = scmp.lt.s32.totalorder %s296_s22, %s296_s22 }
  0x1f   :  { %243 = vmatpush1.bf16.msra.mxu0 %v366_v16  ;;  %p395_p0 = scmp.ne.s32.totalorder %s296_s22, %s394_s23  ;;  %p400_p2 = scmp.lt.s32.totalorder %s394_s23, %s394_s23 }
  0x20   :  { %244 = vmatprep.subr.bf16.mxu0 %v367_v17 }
  0x21   :  { %p401_p3 = por %p400_p2, %p399_p1 }
  0x23   :  { %245 = vmatpush1.bf16.msra.mxu0 %v369_v18  ;;  %p402_p4 = pnand %p401_p3, %p395_p0 }
  0x24   :  { %246 = vmatprep.subr.bf16.mxu0 %v370_v19 }
  0x27   :  { %247 = vmatpush1.bf16.msra.mxu0 %v372_v20 }
  0x28   :  { %248 = vmatprep.subr.bf16.mxu0 %v373_v21 }
  0x2b   :  { %249 = vmatpush1.bf16.msra.mxu0 %v375_v22 }
  0x2c   :  { %250 = vmatprep.subr.bf16.mxu0 %v376_v23 }
  0x2f   :  { %251 = vmatpush1.bf16.msra.mxu0 %v378_v24 }
  0x30   :  { %252 = vmatprep.subr.bf16.mxu0 %v379_v25 }
  0x33   :  { %253 = vmatpush1.bf16.msra.mxu0 %v381_v26 }
  0x34   :  { %254 = vmatprep.subr.bf16.mxu0 %v382_v27 }
  0x37   :  { %255 = vmatpush1.bf16.msra.mxu0 %v384_v28 }
  0x38   :  { %256 = vmatprep.subr.bf16.mxu0 %v385_v29 }
  0x3b   :  { %257 = vmatpush1.bf16.msra.mxu0 %v387_v30 }
  0x3c   :  { %258 = vmatprep.subr.bf16.mxu0 %v388_v31 }
  0x3f   :  { %259 = vmatpush1.bf16.msra.mxu0 %v390_v32 }
  0x42   :  { %261 = vmatmul.mubr.bf16.vlgmr.msra.gmra.mrb[0].mxu0 %v391_v33 }
 0x115   :  { %v262_v34 = vpop.f32.mrb[0].mxu0 }
 0x116   :  { %286 = vst [vmem:[#allocation3] sm:$0xff] %v262_v34  ;;  %v264_v35 = vpop.f32.mrb[1].mxu0 }
 0x117   :  { %287 = vst [vmem:[#allocation3 + $0x8] sm:$0xff] %v264_v35  ;;  %v266_v36 = vpop.f32.mrb[2].mxu0 }
 0x118   :  { %288 = vst [vmem:[#allocation3 + $0x10] sm:$0xff] %v266_v36  ;;  %v268_v37 = vpop.f32.mrb[3].mxu0 }
 0x119   :  { %289 = vst [vmem:[#allocation3 + $0x18] sm:$0xff] %v268_v37 }
 0x11a   :  { %405 = shalt.err (!%p402_p4)
}
 0x11b   :  { %s406_s24 = scalar_lea.hbm %s552_s2, 512 }
 0x11c   :  { %p407_p5 = scmp.ne.s32.totalorder %s552_s2, %s406_s24  ;;  %p410_p6 = scmp.lt.u32.totalorder %s406_s24, %s552_s2 }
 0x11e   :  { %p412_p7 = pnand %p410_p6, %p407_p5 }
 0x120   :  { %415 = shalt.err (!%p412_p7)
}
 0x121   :  { %s419_s29 = smov 256   ;;  %s420_s30 = smov 16  }
 0x122   :  { %301 = dma.vmem_to_hbm [thread:$0]  %s296_s22, 512, %s552_s2, [#allocation4], %s419_s29, %s419_s29, %s420_s30  }
 0x123   :  { %416 = dma.done.wait [#allocation4], 512  }
 0x124   :  { %417 = vsyncadd [#allocation4], 4294966784 }
 0x125   :  { %305 = vsyncpa [#allocation4], 1 }

</bundles_post_ra>
